<compile_context>
chip_gen: v6e
topology: v6e:2x2x1
jax: 0.10.0
libtpu: 0.0.40
codegen_flags: <defaults>
</compile_context>

<pallas_src>
import jax
import jax.numpy as jnp
from jax import lax
from jax.experimental import pallas as pl
from jax.experimental.pallas import tpu as pltpu

EPS = 1e-5

_MAX_TILE_HW = 8192                      # lanes; multiple of 128
_BLOCK_BYTE_BUDGET = 2 * 1024 * 1024     # per block buffer (x4 for dbl-buffered in+out)


def _choose_tile_hw(hw, L, itemsize):
    """Largest lane-dense tile along the H*W axis within the VMEM budget."""
    if hw <= 128:
        return hw                        # full-extent last dim (allowed by Mosaic)
    bytes_per_lane = max(4, itemsize) * L   # f32 compute copy dominates VMEM use
    cap = max(128, (_BLOCK_BYTE_BUDGET // bytes_per_lane) // 128 * 128)
    return min((hw // 128) * 128, _MAX_TILE_HW, cap)


def _layernorm_axis1_kernel(x_ref, w_ref, b_ref, o_ref):
    # x_ref / o_ref: (1, L, T) -- normalized dim L on sublanes, T lane-dense.
    # w_ref / b_ref: (1, L, 1) affine params.
    x = x_ref[...].astype(jnp.float32)
    inv_l = jnp.float32(1.0 / x.shape[1])
    # Single-pass statistics (biased variance, like torch.nn.LayerNorm).
    s1 = jnp.sum(x, axis=1, keepdims=True)        # (1, 1, T)
    s2 = jnp.sum(x * x, axis=1, keepdims=True)    # (1, 1, T)
    mean = s1 * inv_l
    var = s2 * inv_l - mean * mean
    inv = lax.rsqrt(var + EPS)
    w = w_ref[...].astype(jnp.float32)
    b = b_ref[...].astype(jnp.float32)
    o_ref[...] = ((x - mean) * inv * w + b).astype(o_ref.dtype)


def layer_norm_warper(x, weight, bias):
    """Equivalent of LayerNormWarper.forward for x of shape (B, L, ...)."""
    B, L = int(x.shape[0]), int(x.shape[1])
    hw = 1
    for s in x.shape[2:]:
        hw *= int(s)
    x3 = x.reshape(B, L, hw)             # free reshape of the native layout
    w3 = weight.reshape(1, L, 1)
    b3 = bias.reshape(1, L, 1)

    tile = _choose_tile_hw(hw, L, x.dtype.itemsize)
    n_hw = pl.cdiv(hw, tile)

    y3 = pl.pallas_call(
        _layernorm_axis1_kernel,
        out_shape=jax.ShapeDtypeStruct((B, L, hw), x.dtype),
        grid_spec=pltpu.PrefetchScalarGridSpec(
            num_scalar_prefetch=0,
            grid=(B, n_hw),
            in_specs=[
                pl.BlockSpec((1, L, tile), lambda b, j: (b, 0, j)),
                pl.BlockSpec((1, L, 1), lambda b, j: (0, 0, 0)),
                pl.BlockSpec((1, L, 1), lambda b, j: (0, 0, 0)),
            ],
            out_specs=pl.BlockSpec((1, L, tile), lambda b, j: (b, 0, j)),
        ),
        compiler_params=pltpu.CompilerParams(
            dimension_semantics=("parallel", "parallel"),
            vmem_limit_bytes=32 * 1024 * 1024,
        ),
    )(x3, w3, b3)
    return y3.reshape(x.shape)


def _reference(x, weight, bias):
    # Pure-JAX reference matching torch.nn.LayerNorm over axis 1.
    xt = jnp.moveaxis(x, 1, -1).astype(jnp.float32)
    mean = jnp.mean(xt, axis=-1, keepdims=True)
    var = jnp.mean((xt - mean) ** 2, axis=-1, keepdims=True)
    y = (xt - mean) / jnp.sqrt(var + EPS) * weight + bias
    return jnp.moveaxis(y, -1, 1).astype(x.dtype)


if __name__ == "__main__":
    key = jax.random.PRNGKey(0)
    kx, kw, kb, kx2 = jax.random.split(key, 4)

    # Main shape: (B, L, H, W) with dim = L; H*W lane-dense, multiple of 128.
    B, L, H, W = 2, 16, 16, 16
    x = jax.random.normal(kx, (B, L, H, W), dtype=jnp.float32)
    weight = 1.0 + 0.1 * jax.random.normal(kw, (L,), dtype=jnp.float32)
    bias = 0.1 * jax.random.normal(kb, (L,), dtype=jnp.float32)

    out = jax.block_until_ready(layer_norm_warper(x, weight, bias))
    ref = _reference(x, weight, bias)
    assert out.shape == x.shape and out.dtype == x.dtype
    assert jnp.max(jnp.abs(out - ref)) < 1e-4, "mismatch vs reference (main)"

    # Small-spatial path: H*W < 128 -> full-extent lane block.
    B2, L2, H2, W2 = 2, 8, 4, 8
    x2 = jax.random.normal(kx2, (B2, L2, H2, W2), dtype=jnp.float32)
    w2 = jnp.ones((L2,), jnp.float32)
    b2 = jnp.zeros((L2,), jnp.float32)
    out2 = jax.block_until_ready(layer_norm_warper(x2, w2, b2))
    ref2 = _reference(x2, w2, b2)
    assert jnp.max(jnp.abs(out2 - ref2)) < 1e-4, "mismatch vs reference (small)"

    print("KERNEL_OK")
</pallas_src>

<mosaic_0001>
module attributes {stable_mosaic.version = 11 : i64} {
  func.func @_layernorm_axis1_kernel(%arg0: i32, %arg1: i32, %arg2: memref<1x16x256xf32, #tpu.memory_space<vmem>>, %arg3: memref<1x16x1xf32, #tpu.memory_space<vmem>>, %arg4: memref<1x16x1xf32, #tpu.memory_space<vmem>>, %arg5: memref<1x16x256xf32, #tpu.memory_space<vmem>>) attributes {dimension_semantics = [#tpu.dimension_semantics<parallel>, #tpu.dimension_semantics<parallel>], iteration_bounds = array<i64: 2, 1>, scalar_prefetch = 0 : i64, scratch_operands = 0 : i64, tpu.core_type = #tpu.core_type<tc>, window_params = [{transform_indices = @transform_0, window_bounds = array<i64: 1, 16, 256>}, {pipeline_mode = #tpu.pipeline_mode<synchronous>, transform_indices = @transform_1, window_bounds = array<i64: 1, 16, 1>}, {pipeline_mode = #tpu.pipeline_mode<synchronous>, transform_indices = @transform_2, window_bounds = array<i64: 1, 16, 1>}, {transform_indices = @transform_3, window_bounds = array<i64: 1, 16, 256>}]} {
    %c0 = arith.constant 0 : index
    %c0_0 = arith.constant 0 : index
    %c0_1 = arith.constant 0 : index
    %0 = vector.load %arg2[%c0, %c0_0, %c0_1] : memref<1x16x256xf32, #tpu.memory_space<vmem>>, vector<1x16x256xf32>
    %cst = arith.constant dense<0.000000e+00> : vector<1x256xf32>
    %1 = vector.multi_reduction <add>, %0, %cst [1] : vector<1x16x256xf32> to vector<1x256xf32>
    %2 = vector.shape_cast %1 : vector<1x256xf32> to vector<1x1x256xf32>
    %3 = arith.mulf %0, %0 : vector<1x16x256xf32>
    %cst_2 = arith.constant dense<0.000000e+00> : vector<1x256xf32>
    %4 = vector.multi_reduction <add>, %3, %cst_2 [1] : vector<1x16x256xf32> to vector<1x256xf32>
    %5 = vector.shape_cast %4 : vector<1x256xf32> to vector<1x1x256xf32>
    %cst_3 = arith.constant 6.250000e-02 : f32
    %6 = vector.broadcast %cst_3 : f32 to vector<1x1x256xf32>
    %7 = arith.mulf %2, %6 : vector<1x1x256xf32>
    %cst_4 = arith.constant 6.250000e-02 : f32
    %8 = vector.broadcast %cst_4 : f32 to vector<1x1x256xf32>
    %9 = arith.mulf %5, %8 : vector<1x1x256xf32>
    %10 = arith.mulf %7, %7 : vector<1x1x256xf32>
    %11 = arith.subf %9, %10 : vector<1x1x256xf32>
    %cst_5 = arith.constant 9.99999974E-6 : f32
    %12 = vector.broadcast %cst_5 : f32 to vector<1x1x256xf32>
    %13 = arith.addf %11, %12 : vector<1x1x256xf32>
    %14 = math.rsqrt %13 : vector<1x1x256xf32>
    %c0_6 = arith.constant 0 : index
    %c0_7 = arith.constant 0 : index
    %c0_8 = arith.constant 0 : index
    %15 = vector.load %arg3[%c0_6, %c0_7, %c0_8] : memref<1x16x1xf32, #tpu.memory_space<vmem>>, vector<1x16x1xf32>
    %c0_9 = arith.constant 0 : index
    %c0_10 = arith.constant 0 : index
    %c0_11 = arith.constant 0 : index
    %16 = vector.load %arg4[%c0_9, %c0_10, %c0_11] : memref<1x16x1xf32, #tpu.memory_space<vmem>>, vector<1x16x1xf32>
    %17 = vector.broadcast %7 : vector<1x1x256xf32> to vector<1x16x256xf32>
    %18 = arith.subf %0, %17 : vector<1x16x256xf32>
    %19 = vector.broadcast %14 : vector<1x1x256xf32> to vector<1x16x256xf32>
    %20 = arith.mulf %18, %19 : vector<1x16x256xf32>
    %21 = vector.broadcast %15 : vector<1x16x1xf32> to vector<1x16x256xf32>
    %22 = arith.mulf %20, %21 : vector<1x16x256xf32>
    %23 = vector.broadcast %16 : vector<1x16x1xf32> to vector<1x16x256xf32>
    %24 = arith.addf %22, %23 : vector<1x16x256xf32>
    %c0_12 = arith.constant 0 : index
    %c0_13 = arith.constant 0 : index
    %c0_14 = arith.constant 0 : index
    %25 = vector.load %arg5[%c0_12, %c0_13, %c0_14] : memref<1x16x256xf32, #tpu.memory_space<vmem>>, vector<1x16x256xf32>
    tpu.vector_store %arg5[%c0_12, %c0_13, %c0_14], %24 {strides = array<i32>} : memref<1x16x256xf32, #tpu.memory_space<vmem>>, vector<1x16x256xf32>,
    return
  }
  func.func @transform_0(%arg0: i32, %arg1: i32) -> (i32, i32, i32) {
    %c0_i32 = arith.constant 0 : i32
    %c0_i32_0 = arith.constant 0 : i32
    return %arg0, %c0_i32, %arg1 : i32, i32, i32
  }
  func.func @transform_1(%arg0: i32, %arg1: i32) -> (i32, i32, i32) {
    %c0_i32 = arith.constant 0 : i32
    %c0_i32_0 = arith.constant 0 : i32
    %c0_i32_1 = arith.constant 0 : i32
    %c0_i32_2 = arith.constant 0 : i32
    return %c0_i32, %c0_i32_0, %c0_i32_1 : i32, i32, i32
  }
  func.func @transform_2(%arg0: i32, %arg1: i32) -> (i32, i32, i32) {
    %c0_i32 = arith.constant 0 : i32
    %c0_i32_0 = arith.constant 0 : i32
    %c0_i32_1 = arith.constant 0 : i32
    %c0_i32_2 = arith.constant 0 : i32
    return %c0_i32, %c0_i32_0, %c0_i32_1 : i32, i32, i32
  }
  func.func @transform_3(%arg0: i32, %arg1: i32) -> (i32, i32, i32) {
    %c0_i32 = arith.constant 0 : i32
    %c0_i32_0 = arith.constant 0 : i32
    return %arg0, %c0_i32, %arg1 : i32, i32, i32
  }
}

</mosaic_0001>

<bundles_post_ra>
// kernel: tpu_custom_call.1
= control target key start
LH: loop header
LB: loop body
LE: loop exit
PB: predicated region body
PF: predicated region fallthrough
CT: control target
= control target key end

     0   :  { %8 = vsyncpa [#allocation3], 0  ;;  %s793_s0 = inlined_call_operand.hbm [shape: f32[2,16,256], index: 0, kind: input, shape index: {}]   ;;  %s794_s1 = inlined_call_operand.vmem [shape: f32[1,16,1], index: 1, kind: input, shape index: {}]   ;;  %s795_s2 = inlined_call_operand.vmem [shape: f32[1,16,1], index: 2, kind: input, shape index: {}]   ;;  %s796_s3 = inlined_call_operand.hbm [shape: f32[2,16,256], index: 3, kind: output, shape index: {}]  }
   0x1   :  { %10 = vsyncpa [#allocation3 + $0x1], 0 }
   0x2   :  { %11 = vsyncpa [#allocation4], 0 }
   0x3   :  { %13 = vsyncpa [#allocation4 + $0x1], 0  ;;  %s631_s12 = smov 0   ;;  %s633_s13 = smov 0  }
   0x4   :  { %s635_s14 = smov 0   ;;  %s637_s15 = smov 0  }
   0x5   :  { %s639_s16 = smov 0   ;;  %s641_s17 = smov 0  }
   0x6 LB: > { %s404_s18 = sadd.s32 4294967295, %s602_s17   ;;  %s405_s19 = sadd.s32 4294967294, %s602_s17   ;;  %s602_s17 = sphi %s641_s17, %s19_s17   ;;  %s598_s16 = sphi %s639_s16, %s807_s16   ;;  %s594_s15 = sphi %s637_s15, %s806_s15   ;;  %s590_s14 = sphi %s635_s14, %s805_s14   ;;  %s586_s13 = sphi %s633_s13, %s804_s13   ;;  %s582_s12 = sphi %s631_s12, %s803_s12  }
   0x7   : > { %s31_s20 = sadd.s32 1, %s598_s16  ;;  %s40_s21 = sadd.s32 1, %s590_s14 }
   0x8   : > { %p33_p0 = scmp.ge.s32.totalorder %s31_s20, 2  ;;  %p47_p1 = scmp.ne.s32.totalorder %s590_s14, %s586_s13 }
   0x9   : > { %p48_p2 = scmp.eq.s32.totalorder %s602_s17, 0  ;;  %p53_p3 = scmp.ne.s32.totalorder %s586_s13, %s582_s12 }
   0xa   : > { %s809_s20 = smov (%p33_p0, %s31_s20), 0  ;;  %p54_p5 = scmp.eq.s32.totalorder %s404_s18, 0 }
   0xb   : > { %p672_p4 = por %p48_p2, %p47_p1  ;;  %s35_s23 = ssub.s32 %s598_s16, %s809_s20 }
   0xc   : > { %p121_p6 = scmp.eq.s32.totalorder %s404_s18, 1  ;;  %p38_p7 = scmp.eq.s32.totalorder %s35_s23, 0 }
   0xd   : > { %p678_p8 = por %p54_p5, %p53_p3  ;;  %p127_p10 = scmp.eq.s32.totalorder %s405_s19, 1 }
   0xe   : > { %p682_p9 = por %p121_p6, %p47_p1  ;;  %p433_p13 = scmp.lt.s32.totalorder %s602_s17, 2 }
   0xf   : > { %s687_s26 = scalar_select %p38_p7, %s590_s14, %s40_s21  }
  0x10   : > { %p689_p11 = por %p127_p10, %p53_p3  ;;  %s153_s28 = sand.u32 1, %s590_s14  }
  0x11   : > { %s408_s29 = sshll.u32 %s153_s28, 5  ;;  %s419_s30 = sshll.u32 %s598_s16, 9 }
  0x12   : > { %s165_s6 = scalar_lea.hbm %s793_s0, %s419_s30  ;;  %s157_s7 = scalar_lea.vmem [#allocation2], %s408_s29 }
  0x13   : > { %s166_s8 = sshll.u32 %s157_s7, 4  ;;  %p702_p0 = pnand %p433_p13, %p672_p4  ;;  %s167_s8 = int_to_ptr.vmem [resolvable:$true] %s166_s8 }
  0x14   : > { %p411_p1 = scmp.ge.s32.totalorder %s602_s17, 1  ;;  %s154_s10 = scalar_lea.sflag [#allocation3], %s153_s28 }
  0x15   : > { %p496_p2 = pneg %p702_p0  ;;  %s507_s11 = scalar_lea.vmem %s167_s8, 512 }
  0x16   : > { %p508_p3 = scmp.ne.s32.totalorder %s167_s8, %s507_s11  ;;  %s604_s18 = smov [#allocation2]  }
  0x17   : > { %s512_s19 = sshll.u32 %s604_s18, 4  ;;  %s513_s19 = int_to_ptr.vmem [resolvable:$false] %s512_s19 }
  0x18   : > { %p510_p5 = pnand %p508_p3, %p496_p2  ;;  %s514_s21 = scalar_lea.vmem %s513_s19, 1024 }
  0x19   : > { %p515_p7 = scmp.lt.s32.totalorder %s167_s8, %s513_s19  ;;  %p516_p10 = scmp.lt.s32.totalorder %s514_s21, %s507_s11 }
  0x1a   : > { %p511_p6 = pneg %p510_p5 }
  0x1b   : > { %p517_p12 = por %p516_p10, %p515_p7 }
  0x1d   : > { %p518_p4 = pnand %p517_p12, %p511_p6 }
  0x1f   : > { %521 = shalt.err (!%p518_p4)
}
  0x20   : > { %s605_s22 = smov 256   ;;  %s606_s23 = smov 16  }
  0x21   : > { %428 = dma.hbm_to_vmem [thread:$0]  (!%p702_p0), %s165_s6, 512, %s167_s8, %s154_s10, %s605_s22, %s605_s22, %s606_s23  }
  0x22   : > { %p174_p13 = scmp.lt.s32.totalorder %s602_s17, 3 }
  0x24   : > { %p175_p2 = pnand %p411_p1, %p174_p13 }
  0x25   : > { %s715_s28 = sand.u32 (!%p175_p2), 1, %s586_s13  }
  0x26   : > { %178 = sbr.rel (%p175_p2) target bundleno = 192 (0xc0), region = 32  ;;  %s412_s29 = sshll.u32 (!%p175_p2), %s715_s28, 5 }
  0x27   : > { %s181_s30 = scalar_lea.sflag (!%p175_p2), [#allocation3], %s715_s28  ;;  %s184_s4 = scalar_lea.vmem (!%p175_p2), [#allocation2], %s412_s29 }
  0x2b   : > { %573 = dma.done.wait (%p678_p8), %s181_s30, 512  }
  0x2c   : > { %575 = vsyncadd (%p678_p8), %s181_s30, 4294966784  ;;  %v607_v0 = vmov 0   ;;  %v259_v1 = vld [vmem:[%s795_s2] sm:$0xff]  ;;  %v260_v3 = vld [vmem:[%s795_s2 + $0x8] sm:$0xff]  ;;  %s206_s18 = scalar_lea.vmem [#allocation5], %s412_s29  ;;  %s420_s21 = sshll.u32 %s594_s15, 9 }
  0x2d   : > { %489 = vset.pattern.permute.xlu1 %v607_v0  ;;  %488 = vset.pattern.permute.xlu0 %v607_v0  ;;  %v257_v2 = vld [vmem:[%s794_s1] sm:$0xff]  ;;  %v258_v4 = vld [vmem:[%s794_s1 + $0x8] sm:$0xff]  ;;  %v211_v6 = vld [vmem:[%s184_s4 + $0x10] sm:$0xff]  ;;  %s317_s19 = sshll.u32 %s206_s18, 4  ;;  %s745_s29 = scalar_lea.hbm %s796_s3, %s420_s21  ;;  %s740_s19 = int_to_ptr.vmem [resolvable:$true] %s317_s19 }
  0x2e   : > { %285 = vperm.xlu1 %489, %v259_v1   ;;  %271 = vperm.xlu0 %488, %v257_v2   ;;  %v209_v5 = vld [vmem:[%s184_s4] sm:$0xff]  ;;  %v210_v7 = vld [vmem:[%s184_s4 + $0x8] sm:$0xff]  ;;  %v212_v8 = vld [vmem:[%s184_s4 + $0x18] sm:$0xff]  ;;  %v229_v11 = vmul.f32 %v211_v6, %v211_v6  ;;  %s302_s15 = scalar_lea.sflag [#allocation4], %s715_s28  ;;  %s522_s30 = scalar_lea.vmem %s740_s19, 512 }
  0x2f   : > { %v213_v9 = vadd.f32 %v211_v6, %v209_v5  ;;  %v227_v10 = vmul.f32 %v209_v5, %v209_v5  ;;  %v220_v12 = vadd.f32 %v212_v8, %v210_v7  ;;  %v228_v13 = vmul.f32 %v210_v7, %v210_v7  ;;  %p523_p8 = scmp.ne.s32.totalorder %s740_s19, %s522_s30  ;;  %s608_s4 = smov [#allocation5]  }
  0x30   : > { %v230_v14 = vmul.f32 %v212_v8, %v212_v8  ;;  %s526_s5 = sshll.u32 %s608_s4, 4  ;;  %s527_s5 = int_to_ptr.vmem [resolvable:$false] %s526_s5 }
  0x31   : > { %v214_v15 = vrot.slane %v213_v9, 4  ;;  %v231_v16 = vadd.f32 %v229_v11, %v227_v10  ;;  %v221_v17 = vrot.slane %v220_v12, 4  ;;  %p524_p12 = pnand %p523_p8, %p682_p9  ;;  %s528_s6 = scalar_lea.vmem %s527_s5, 1024 }
  0x32   : > { %290 = vperm.xlu1 %489, %v260_v3   ;;  %276 = vperm.xlu0 %488, %v258_v4   ;;  %v238_v18 = vadd.f32 %v230_v14, %v228_v13  ;;  %p529_p1 = scmp.lt.s32.totalorder %s740_s19, %s527_s5  ;;  %p530_p3 = scmp.lt.s32.totalorder %s528_s6, %s522_s30 }
  0x33   : > { %v215_v19 = vadd.f32 %v214_v15, %v213_v9  ;;  %v232_v20 = vrot.slane %v231_v16, 4  ;;  %v222_v21 = vadd.f32 %v221_v17, %v220_v12  ;;  %p525_p0 = pneg %p524_p12 }
  0x34   : > { %v239_v22 = vrot.slane %v238_v18, 4  ;;  %p531_p5 = por %p530_p3, %p529_p1 }
  0x35   : > { %v216_v23 = vrot.slane %v215_v19, 2  ;;  %v233_v24 = vadd.f32 %v232_v20, %v231_v16  ;;  %v223_v25 = vrot.slane %v222_v21, 2 }
  0x36   : > { %v240_v26 = vadd.f32 %v239_v22, %v238_v18  ;;  %p532_p6 = pnand %p531_p5, %p525_p0 }
  0x37   : > { %v217_v27 = vadd.f32 %v216_v23, %v215_v19  ;;  %v234_v28 = vrot.slane %v233_v24, 2  ;;  %v224_v29 = vadd.f32 %v223_v25, %v222_v21 }
  0x38   : > { %v241_v30 = vrot.slane %v240_v26, 2 }
  0x39   : > { %v218_v31 = vrot.slane %v217_v27, 1  ;;  %v235_v32 = vadd.f32 %v234_v28, %v233_v24  ;;  %v225_v33 = vrot.slane %v224_v29, 1 }
  0x3a   : > { %v242_v34 = vadd.f32 %v241_v30, %v240_v26 }
  0x3b   : > { %v219_v35 = vadd.f32 %v218_v31, %v217_v27  ;;  %v236_v36 = vrot.slane %v235_v32, 1  ;;  %v226_v37 = vadd.f32 %v225_v33, %v224_v29 }
  0x3c   : > { %v243_v38 = vrot.slane %v242_v34, 1 }
  0x3d   : > { %v237_v39 = vadd.f32 %v236_v36, %v235_v32  ;;  %v245_v40 = vmul.f32 0.0625, %v219_v35  ;;  %v246_v42 = vmul.f32 0.0625, %v226_v37 }
  0x3e   : > { %v244_v41 = vadd.f32 %v243_v38, %v242_v34 }
  0x3f   : > { %v247_v43 = vmul.f32 0.0625, %v237_v39  ;;  %v249_v44 = vmul.f32 %v245_v40, %v245_v40  ;;  %v250_v46 = vmul.f32 %v246_v42, %v246_v42  ;;  %v261_v52 = vsub.f32 %v209_v5, %v245_v40 }
  0x40   : > { %v248_v45 = vmul.f32 0.0625, %v244_v41  ;;  %v262_v53 = vsub.f32 %v210_v7, %v246_v42  ;;  %v263_v57 = vsub.f32 %v211_v6, %v245_v40  ;;  %v264_v58 = vsub.f32 %v212_v8, %v246_v42 }
  0x41   : > { %v251_v47 = vsub.f32 %v247_v43, %v249_v44 }
  0x42   : > { %v252_v48 = vsub.f32 %v248_v45, %v250_v46 }
  0x43   : > { %v253_v49 = vadd.f32 1e-05, %v251_v47 }
  0x44   : > { %v254_v50 = vadd.f32 1e-05, %v252_v48 }
  0x45   : > { %490 = vrsqrt.f32 %v253_v49 }
  0x46   : > { %492 = vrsqrt.f32 %v254_v50 }
  0x52   : > { %v491_v51 = vpop.eup %490 }
  0x53   : > { %v493_v54 = vpop.eup %492  ;;  %v265_v55 = vmul.f32 %v491_v51, %v261_v52  ;;  %v267_v63 = vmul.f32 %v491_v51, %v263_v57 }
  0x54   : > { %v266_v56 = vmul.f32 %v493_v54, %v262_v53  ;;  %v268_v0 = vmul.f32 %v493_v54, %v264_v58 }
  0xa9   : > { %v286_v59 = vpop.permute.xlu1 %285  ;;  %v272_v60 = vpop.permute.xlu0 %271 }
  0xaa   : > { %v279_v61 = vmul.f32 %v272_v60, %v265_v55  ;;  %v280_v62 = vmul.f32 %v272_v60, %v266_v56 }
  0xac   : > { %v293_v1 = vadd.f32 %v286_v59, %v279_v61  ;;  %v294_v2 = vadd.f32 %v286_v59, %v280_v62 }
  0xad   : > { %v277_v3 = vpop.permute.xlu0 %276  ;;  %v291_v6 = vpop.permute.xlu1 %290 }
  0xae   : > { %297 = vst [vmem:[%s206_s18] sm:$0xff] %v293_v1  ;;  %298 = vst [vmem:[%s206_s18 + $0x8] sm:$0xff] %v294_v2  ;;  %v281_v4 = vmul.f32 %v277_v3, %v267_v63  ;;  %v282_v5 = vmul.f32 %v277_v3, %v268_v0 }
  0xb0   : > { %v295_v7 = vadd.f32 %v291_v6, %v281_v4  ;;  %v296_v8 = vadd.f32 %v291_v6, %v282_v5 }
  0xb2   : > { %299 = vst [vmem:[%s206_s18 + $0x10] sm:$0xff] %v295_v7  ;;  %300 = vst [vmem:[%s206_s18 + $0x18] sm:$0xff] %v296_v8 }
  0xb3   : > { %535 = shalt.err (!%p532_p6)
}
  0xb4   : > { %s536_s7 = scalar_lea.hbm %s745_s29, 512  ;;  %s540_s10 = scalar_lea.hbm %s796_s3, 1024 }
  0xb5   : > { %p537_p7 = scmp.ne.s32.totalorder %s745_s29, %s536_s7  ;;  %p541_p13 = scmp.lt.s32.totalorder %s745_s29, %s796_s3 }
  0xb6   : > { %p542_p2 = scmp.lt.s32.totalorder %s540_s10, %s536_s7 }
  0xb7   : > { %p538_p10 = pnand %p537_p7, %p682_p9 }
  0xb8   : > { %p543_p8 = por %p542_p2, %p541_p13 }
  0xb9   : > { %p539_p4 = pneg %p538_p10 }
  0xbb   : > { %p544_p12 = pnand %p543_p8, %p539_p4 }
  0xbd   : > { %547 = shalt.err (!%p544_p12)
}
  0xbe   : > { %s609_s18 = smov 256   ;;  %s610_s21 = smov 16  }
  0xbf   : > { %423 = dma.vmem_to_hbm [thread:$0]  (%p682_p9), %s740_s19, 512, %s745_s29, %s302_s15, %s609_s18, %s609_s18, %s610_s21  }
  0xc0 PF: > { %s332_s22 = sand.u32 1, %s582_s12   ;;  %p802_p0 = scmp.ge.s32.totalorder %s602_s17, 2 }
  0xc1   : > { %s333_s23 = scalar_lea.sflag [#allocation4], %s332_s22 }
  0xc2   : > { %p430_p1 = pnand %p802_p0, %p689_p11 }
  0xc4   : > { %p431_p3 = pneg %p430_p1 }
  0xc6   : > { %577 = dma.done.wait (%p431_p3), %s333_s23, 512  }
  0xc7   : > { %579 = vsyncadd (%p431_p3), %s333_s23, 4294966784  ;;  %s19_s17 = sadd.s32 1, %s602_s17   ;;  %s803_s12 = smov %s586_s13 }
  0xc8   : > { %p16_p5 = scmp.ge.s32.totalorder %s19_s17, 4   ;;  %s804_s13 = smov %s590_s14 }
  0xc9   : > { %s805_s14 = smov %s687_s26  ;;  %s806_s15 = smov %s598_s16 }
  0xca   : > { %s807_s16 = smov %s809_s20  ;;  %18 = sbr.rel (!%p16_p5) target bundleno = 6 (0x6), region = 77 }
  0xcf   :  { %338 = vsyncpa [#allocation3], 1 }
  0xd0   :  { %340 = vsyncpa [#allocation3 + $0x1], 1 }
  0xd1   :  { %341 = vsyncpa [#allocation4], 1 }
  0xd2   :  { %343 = vsyncpa [#allocation4 + $0x1], 1 }

</bundles_post_ra>
